<compile_context>
chip_gen: v7x
topology: tpu7x:2x2x1
jax: 0.10.0
libtpu: 0.0.40
codegen_flags: <defaults>
</compile_context>

<pallas_src>
import functools

import jax
import jax.numpy as jnp
from jax.experimental import pallas as pl
from jax.experimental.pallas import tpu as pltpu

_MIB = 1024 * 1024


# --------------------------------------------------------------------------- #
# Hardware / tiling heuristics
# --------------------------------------------------------------------------- #
def _vmem_capacity_bytes():
    # Conservative fallback (v7x-class, 64 MiB per TensorCore) when the query
    # is unavailable: safe on every generation, slightly sub-optimal on the
    # 128 MiB parts.
    try:
        return int(pltpu.get_tpu_info().vmem_capacity_bytes)
    except Exception:
        return 64 * _MIB


def _sublane_packing(itemsize):
    # vreg sublane packing: f32 -> 8 rows, bf16 -> 16, int8/fp8 -> 32.
    return {4: 8, 2: 16, 1: 32}.get(itemsize, 8)


def _round_up(v, m):
    return ((v + m - 1) // m) * m


def _fused_plan(rows, hw, itemsize):
    """Pick (rows_per_block, vmem_limit, dual_tc) for the fused single-pass path.

    Returns rows_per_block=None when even the minimum (packing-rows) block does
    not fit the VMEM budget -> caller falls back to the spatially split path.
    """
    packing = _sublane_packing(itemsize)
    vmem_cap = _vmem_capacity_bytes()
    dual_tc = vmem_cap <= 64 * _MIB          # v7x-class heuristic (2 TCs/chip)
    vmem_limit = 40 * _MIB if dual_tc else 80 * _MIB

    # Real live set per block row: 2x input + 2x output double buffers in the
    # input dtype plus ~4 block-sized f32 intermediates Mosaic materializes for
    # the elementwise chain (cast, d, d*d, sigmoid/product).
    live_per_row = hw * (4 * itemsize + 4 * 4)

    budget = int(0.6 * vmem_limit)
    if packing * live_per_row > budget:
        return None, vmem_limit, dual_tc     # -> spatially split two-pass path

    # ~2 MiB input tiles already sit at ~85% of the HBM streaming roofline;
    # larger tiles only add VMEM pressure.
    rows_by_tile = (2 * _MIB) // max(hw * itemsize, 1)
    rows_by_vmem = budget // max(live_per_row, 1)
    rpb = max(packing, min(rows_by_tile, rows_by_vmem))

    # Keep enough grid steps for DMA overlap / megacore sharding: dual-TC parts
    # want an even step count >= 4; single-TC parts only need ~3.
    min_steps = 4 if dual_tc else 3
    if rows > packing * min_steps:
        rpb = min(rpb, max(packing, rows // min_steps))

    rpb = max(packing, (rpb // packing) * packing)
    rpb = min(rpb, _round_up(rows, packing))     # never larger than the array

    if dual_tc:
        steps = pl.cdiv(rows, rpb)
        if steps > 1 and steps % 2:
            # Nudge toward an even step count so both TensorCores stay busy.
            rpb = max(packing, _round_up(pl.cdiv(rows, steps + 1), packing))

    return int(rpb), int(vmem_limit), dual_tc


def _split_plan(rows, hw, itemsize):
    """(row_block, hw_chunk) for the spatially split two-pass path."""
    packing = _sublane_packing(itemsize)
    rb = packing
    # ~2 MiB of input per block; chunk must be a lane multiple (128).
    ck = (2 * _MIB) // max(rb * itemsize, 1)
    ck = max(128, (ck // 128) * 128)
    ck = min(ck, _round_up(hw, 128))
    return int(rb), int(ck)


# --------------------------------------------------------------------------- #
# Kernels
# --------------------------------------------------------------------------- #
def _simam_fused_kernel(x_ref, o_ref, *, inv_hw, inv_n, e_lambda):
    # x_ref / o_ref: (rows_per_block, H*W) block in VMEM.  All math in f32.
    x = x_ref[...].astype(jnp.float32)
    # Reference-faithful two-pass inside the VMEM-resident block (mean, then
    # centered square): better numerics than sxx - sx*mu, free at HBM-bound.
    mu = jnp.sum(x, axis=-1, keepdims=True) * inv_hw
    d = x - mu
    d2 = d * d
    s = jnp.sum(d2, axis=-1, keepdims=True)
    inv = 1.0 / (4.0 * (s * inv_n + e_lambda))      # per-row divide only
    y = d2 * inv + 0.5
    o_ref[...] = (x * jax.nn.sigmoid(y)).astype(o_ref.dtype)


def _simam_reduce_kernel(x_ref, sx_ref, sxx_ref, *, hw, chunk):
    # Grid: (row_blocks, hw_chunks); hw axis is "arbitrary" (reduction).
    j = pl.program_id(1)

    @pl.when(j == 0)
    def _():
        sx_ref[...] = jnp.zeros_like(sx_ref)
        sxx_ref[...] = jnp.zeros_like(sxx_ref)

    x = x_ref[...].astype(jnp.float32)
    # Mask lanes past the end of the (possibly partial) last spatial chunk so
    # padded garbage never enters the reduction.
    col = jax.lax.broadcasted_iota(jnp.int32, x.shape, dimension=1)
    x = jnp.where(col < hw - j * chunk, x, 0.0)
    sx_ref[...] += jnp.sum(x, axis=-1, keepdims=True)
    sxx_ref[...] += jnp.sum(x * x, axis=-1, keepdims=True)


def _simam_apply_kernel(x_ref, mu_ref, inv_ref, o_ref):
    # Elementwise pass for the split path; per-row mu / inv broadcast on lanes.
    x = x_ref[...].astype(jnp.float32)
    d = x - mu_ref[...]
    y = d * d * inv_ref[...] + 0.5
    o_ref[...] = (x * jax.nn.sigmoid(y)).astype(o_ref.dtype)


# --------------------------------------------------------------------------- #
# Wrapper
# --------------------------------------------------------------------------- #
def simam(x, e_lambda=1e-4, donate_input=False, force_split=False):
    """x: (N, C, H, W) array -> (N, C, H, W), matching the PyTorch module."""
    N, C, H, W = x.shape
    hw = H * W
    rows = N * C
    itemsize = jnp.dtype(x.dtype).itemsize
    e_lambda = float(e_lambda)
    inv_hw = 1.0 / float(hw)
    # hw == 1 is degenerate in the reference (0/0 -> NaN); treat n as 1 instead.
    inv_n = 1.0 / float(max(hw - 1, 1))

    # Flatten NCHW -> (rows, H*W): the spatial reduction is a lane reduction and
    # the output stays lane-dense for common SR feature maps (H*W >= 256).
    # TODO(synk): for H*W < 128, a transposed (H*W, rows) layout would avoid
    # masked partial stores on tiny late-stage feature maps.
    x2d = x.reshape(rows, hw)

    rpb, vmem_limit, _ = _fused_plan(rows, hw, itemsize)
    if force_split:
        rpb = None
    io_alias = {0: 0} if donate_input else {}

    # ------------------------------------------------------------------ #
    # Fused single-pass path: one (rows_per_block, H*W) block per grid step.
    # ------------------------------------------------------------------ #
    if rpb is not None:
        grid = (pl.cdiv(rows, rpb),)          # ragged last block: rows are
        kernel = functools.partial(           # independent, so no padding needed
            _simam_fused_kernel, inv_hw=inv_hw, inv_n=inv_n, e_lambda=e_lambda)
        out2d = pl.pallas_call(
            kernel,
            out_shape=jax.ShapeDtypeStruct((rows, hw), x.dtype),
            grid_spec=pltpu.PrefetchScalarGridSpec(
                num_scalar_prefetch=0,
                grid=grid,
                in_specs=[pl.BlockSpec((rpb, hw), lambda i: (i, 0))],
                out_specs=pl.BlockSpec((rpb, hw), lambda i: (i, 0)),
            ),
            compiler_params=pltpu.CompilerParams(
                dimension_semantics=("parallel",),
                vmem_limit_bytes=vmem_limit,
            ),
            cost_estimate=pl.CostEstimate(
                flops=int(10 * rows * hw),
                transcendentals=int(rows * hw),
                bytes_accessed=int(2 * rows * hw * itemsize),
            ),
            input_output_aliases=io_alias,
        )(x2d)
        return out2d.reshape(N, C, H, W)

    # ------------------------------------------------------------------ #
    # Spatially split two-pass path for very large H*W.
    # Pass 1: accumulate per-row sum / sum-of-squares across hw chunks.
    # Pass 2: elementwise apply with per-row mu / inverse denominator.
    # ------------------------------------------------------------------ #
    rb, ck = _split_plan(rows, hw, itemsize)
    grid = (pl.cdiv(rows, rb), pl.cdiv(hw, ck))

    reduce_kernel = functools.partial(_simam_reduce_kernel, hw=hw, chunk=ck)
    sx, sxx = pl.pallas_call(
        reduce_kernel,
        out_shape=(jax.ShapeDtypeStruct((rows, 1), jnp.float32),
                   jax.ShapeDtypeStruct((rows, 1), jnp.float32)),
        grid_spec=pltpu.PrefetchScalarGridSpec(
            num_scalar_prefetch=0,
            grid=grid,
            in_specs=[pl.BlockSpec((rb, ck), lambda i, j: (i, j))],
            out_specs=[pl.BlockSpec((rb, 1), lambda i, j: (i, 0)),
                       pl.BlockSpec((rb, 1), lambda i, j: (i, 0))],
        ),
        compiler_params=pltpu.CompilerParams(
            dimension_semantics=("parallel", "arbitrary"),
            vmem_limit_bytes=vmem_limit,
        ),
        cost_estimate=pl.CostEstimate(
            flops=int(3 * rows * hw),
            transcendentals=0,
            bytes_accessed=int(rows * hw * itemsize),
        ),
    )(x2d)

    # Tiny per-row epilogue in plain JAX (rows elements only).
    mu = sx * inv_hw
    # sum((x-mu)^2) == sxx - sx*mu; clamp against f32 cancellation for
    # near-constant rows (e_lambda keeps the denominator positive anyway).
    s = jnp.maximum(sxx - sx * mu, 0.0)
    inv = 1.0 / (4.0 * (s * inv_n + e_lambda))

    out2d = pl.pallas_call(
        _simam_apply_kernel,
        out_shape=jax.ShapeDtypeStruct((rows, hw), x.dtype),
        grid_spec=pltpu.PrefetchScalarGridSpec(
            num_scalar_prefetch=0,
            grid=grid,
            in_specs=[pl.BlockSpec((rb, ck), lambda i, j: (i, j)),
                      pl.BlockSpec((rb, 1), lambda i, j: (i, 0)),
                      pl.BlockSpec((rb, 1), lambda i, j: (i, 0))],
            out_specs=pl.BlockSpec((rb, ck), lambda i, j: (i, j)),
        ),
        compiler_params=pltpu.CompilerParams(
            dimension_semantics=("parallel", "parallel"),
            vmem_limit_bytes=vmem_limit,
        ),
        cost_estimate=pl.CostEstimate(
            flops=int(8 * rows * hw),
            transcendentals=int(rows * hw),
            bytes_accessed=int(2 * rows * hw * itemsize),
        ),
        input_output_aliases=io_alias,
    )(x2d, mu, inv)
    return out2d.reshape(N, C, H, W)


def simam_reference(x, e_lambda=1e-4):
    # Pure-JAX reference mirroring the PyTorch forward, for validation.
    _, _, h, w = x.shape
    n = w * h - 1
    mu = jnp.mean(x, axis=(2, 3), keepdims=True)
    d2 = (x - mu) ** 2
    y = d2 / (4.0 * (jnp.sum(d2, axis=(2, 3), keepdims=True) / n + e_lambda)) + 0.5
    return x * jax.nn.sigmoid(y)


if __name__ == "__main__":
    key = jax.random.PRNGKey(0)
    k0, k1, k2, k3 = jax.random.split(key, 4)

    # 1) Primary small-shape check (non-zero mean exercises the numerics).
    x = jax.random.normal(k0, (2, 4, 16, 16), dtype=jnp.float32) * 2.0 + 3.0
    out = simam(x)
    jax.block_until_ready(out)
    ref = simam_reference(x)
    assert out.shape == x.shape and out.dtype == x.dtype
    assert jnp.allclose(out, ref, atol=1e-5, rtol=1e-5)

    # 2) Non-divisible N*C exercises the ragged (un-padded) last row block.
    x2 = jax.random.normal(k1, (2, 3, 16, 16), dtype=jnp.float32)
    out2 = simam(x2)
    jax.block_until_ready(out2)
    assert jnp.allclose(out2, simam_reference(x2), atol=1e-5, rtol=1e-5)

    # 3) Multi-step grid on the fused path.
    x3 = jax.random.normal(k2, (2, 64, 32, 32), dtype=jnp.float32)
    out3 = simam(x3)
    jax.block_until_ready(out3)
    assert jnp.allclose(out3, simam_reference(x3), atol=1e-5, rtol=1e-5)

    # 4) Spatially split two-pass path (forced), with a partial masked hw chunk.
    x4 = jax.random.normal(k3, (1, 2, 300, 300), dtype=jnp.float32)
    out4 = simam(x4, force_split=True)
    jax.block_until_ready(out4)
    assert jnp.allclose(out4, simam_reference(x4), atol=1e-4, rtol=1e-4)

    print("KERNEL_OK")
</pallas_src>

<mosaic_0001>
module attributes {stable_mosaic.version = 11 : i64} {
  func.func @_simam_fused_kernel(%arg0: i32, %arg1: memref<8x256xf32, #tpu.memory_space<vmem>>, %arg2: memref<8x256xf32, #tpu.memory_space<vmem>>) attributes {dimension_semantics = [#tpu.dimension_semantics<parallel>], iteration_bounds = array<i64: 1>, scalar_prefetch = 0 : i64, scratch_operands = 0 : i64, tpu.core_type = #tpu.core_type<tc>, window_params = [{transform_indices = @transform_0, window_bounds = array<i64: 8, 256>}, {transform_indices = @transform_1, window_bounds = array<i64: 8, 256>}]} {
    %c0 = arith.constant 0 : index
    %c0_0 = arith.constant 0 : index
    %0 = vector.load %arg1[%c0, %c0_0] : memref<8x256xf32, #tpu.memory_space<vmem>>, vector<8x256xf32>
    %cst = arith.constant dense<0.000000e+00> : vector<8xf32>
    %1 = vector.multi_reduction <add>, %0, %cst [1] : vector<8x256xf32> to vector<8xf32>
    %2 = vector.shape_cast %1 : vector<8xf32> to vector<8x1xf32>
    %cst_1 = arith.constant 3.906250e-03 : f32
    %3 = vector.broadcast %cst_1 : f32 to vector<8x1xf32>
    %4 = arith.mulf %2, %3 : vector<8x1xf32>
    %5 = vector.broadcast %4 : vector<8x1xf32> to vector<8x256xf32>
    %6 = arith.subf %0, %5 : vector<8x256xf32>
    %7 = arith.mulf %6, %6 : vector<8x256xf32>
    %cst_2 = arith.constant dense<0.000000e+00> : vector<8xf32>
    %8 = vector.multi_reduction <add>, %7, %cst_2 [1] : vector<8x256xf32> to vector<8xf32>
    %9 = vector.shape_cast %8 : vector<8xf32> to vector<8x1xf32>
    %cst_3 = arith.constant 0.00392156886 : f32
    %10 = vector.broadcast %cst_3 : f32 to vector<8x1xf32>
    %11 = arith.mulf %9, %10 : vector<8x1xf32>
    %cst_4 = arith.constant 9.99999974E-5 : f32
    %12 = vector.broadcast %cst_4 : f32 to vector<8x1xf32>
    %13 = arith.addf %11, %12 : vector<8x1xf32>
    %cst_5 = arith.constant 4.000000e+00 : f32
    %14 = vector.broadcast %cst_5 : f32 to vector<8x1xf32>
    %15 = arith.mulf %14, %13 : vector<8x1xf32>
    %cst_6 = arith.constant 1.000000e+00 : f32
    %16 = vector.broadcast %cst_6 : f32 to vector<8x1xf32>
    %17 = arith.divf %16, %15 : vector<8x1xf32>
    %18 = vector.broadcast %17 : vector<8x1xf32> to vector<8x256xf32>
    %19 = arith.mulf %7, %18 : vector<8x256xf32>
    %cst_7 = arith.constant 5.000000e-01 : f32
    %20 = vector.broadcast %cst_7 : f32 to vector<8x256xf32>
    %21 = arith.addf %19, %20 : vector<8x256xf32>
    %22 = arith.negf %21 : vector<8x256xf32>
    %23 = math.exp %22 : vector<8x256xf32>
    %cst_8 = arith.constant 1.000000e+00 : f32
    %24 = vector.broadcast %cst_8 : f32 to vector<8x256xf32>
    %25 = arith.addf %24, %23 : vector<8x256xf32>
    %26 = arith.divf %24, %25 : vector<8x256xf32>
    %27 = arith.mulf %0, %26 : vector<8x256xf32>
    %c0_9 = arith.constant 0 : index
    %c0_10 = arith.constant 0 : index
    %28 = vector.load %arg2[%c0_9, %c0_10] : memref<8x256xf32, #tpu.memory_space<vmem>>, vector<8x256xf32>
    tpu.vector_store %arg2[%c0_9, %c0_10], %27 {strides = array<i32>} : memref<8x256xf32, #tpu.memory_space<vmem>>, vector<8x256xf32>,
    return
  }
  func.func @transform_0(%arg0: i32) -> (i32, i32) {
    %c0_i32 = arith.constant 0 : i32
    %c0_i32_0 = arith.constant 0 : i32
    return %arg0, %c0_i32 : i32, i32
  }
  func.func @transform_1(%arg0: i32) -> (i32, i32) {
    %c0_i32 = arith.constant 0 : i32
    %c0_i32_0 = arith.constant 0 : i32
    return %arg0, %c0_i32 : i32, i32
  }
}

</mosaic_0001>

<bundles_post_ra>
// kernel: tpu_custom_call.1
= control target key start
LH: loop header
LB: loop body
LE: loop exit
PB: predicated region body
PF: predicated region fallthrough
CT: control target
= control target key end

     0   :  { %6 = vsyncpa [#allocation3], 0  ;;  %s172_s0 = inlined_call_operand.hbm [shape: f32[8,256], index: 0, kind: input, shape index: {}]   ;;  %s173_s1 = inlined_call_operand.hbm [shape: f32[8,256], index: 1, kind: output, shape index: {}]  }
   0x1   :  { %7 = vsyncpa [#allocation4], 0  ;;  %s136_s6 = smov [#allocation2]   ;;  %s88_s10 = scalar_lea.hbm %s172_s0, 256 }
   0x2   :  { %s14_s7 = sshll.u32 %s136_s6, 4  ;;  %p89_p0 = scmp.ne.s32.totalorder %s172_s0, %s88_s10  ;;  %s15_s7 = int_to_ptr.vmem [resolvable:$true] %s14_s7 }
   0x3   :  { %p92_p1 = scmp.lt.u32.totalorder %s88_s10, %s172_s0 }
   0x5   :  { %p94_p2 = pnand %p92_p1, %p89_p0 }
   0x7   :  { %97 = shalt.err (!%p94_p2)
}
   0x8   :  { %s98_s15 = scalar_lea.vmem %s15_s7, 256  ;;  %p103_p4 = scmp.lt.s32.totalorder %s15_s7, %s15_s7 }
   0x9   :  { %p99_p3 = scmp.ne.s32.totalorder %s15_s7, %s98_s15  ;;  %p104_p5 = scmp.lt.s32.totalorder %s98_s15, %s98_s15 }
   0xb   :  { %p105_p6 = por %p104_p5, %p103_p4 }
   0xd   :  { %p106_p7 = pnand %p105_p6, %p99_p3 }
   0xf   :  { %109 = shalt.err (!%p106_p7)
}
  0x10   :  { %17 = dma.hbm_to_vmem [thread:$0]  %s172_s0, 256, %s15_s7, [#allocation3]  }
  0x11   :  { %132 = dma.done.wait [#allocation3], 256  }
  0x12   :  { %133 = vsyncadd [#allocation3], 4294967040  ;;  %v21_v0 = vld [vmem:[#allocation2] sm:$0xff]  ;;  %v22_v1 = vld [vmem:[#allocation2 + $0x8] sm:$0xff]  ;;  %s137_s0 = smov [#allocation5]  }
  0x13   :  { %v23_v2 = vadd.f32 %v22_v1, %v21_v0  ;;  %s65_s18 = sshll.u32 %s137_s0, 4  ;;  %s66_s18 = int_to_ptr.vmem [resolvable:$true] %s65_s18 }
  0x14   :  { %s110_s19 = scalar_lea.vmem %s66_s18, 256  ;;  %p115_p9 = scmp.lt.s32.totalorder %s66_s18, %s66_s18 }
  0x15   :  { %24 = vadd.xlane.f32.xlu0 %v23_v2  ;;  %p111_p8 = scmp.ne.s32.totalorder %s66_s18, %s110_s19  ;;  %p116_p10 = scmp.lt.s32.totalorder %s110_s19, %s110_s19 }
  0x17   :  { %p117_p11 = por %p116_p10, %p115_p9 }
  0x19   :  { %p118_p12 = pnand %p117_p11, %p111_p8 }
  0xa2   :  { %v25_v3 = vpop.xlane.xlu0 %24 }
  0xa3   :  { %v26_v4 = vmul.f32 0.00390625, %v25_v3 }
  0xa5   :  { %v27_v5 = vsub.f32 %v21_v0, %v26_v4  ;;  %v28_v6 = vsub.f32 %v22_v1, %v26_v4 }
  0xa7   :  { %v29_v7 = vmul.f32 %v27_v5, %v27_v5  ;;  %v30_v8 = vmul.f32 %v28_v6, %v28_v6 }
  0xa9   :  { %v31_v9 = vadd.f32 %v30_v8, %v29_v7 }
  0xab   :  { %32 = vadd.xlane.f32.xlu0 %v31_v9 }
 0x138   :  { %v33_v10 = vpop.xlane.xlu0 %32 }
 0x139   :  { %v34_v11 = vmul.f32 0.003921569, %v33_v10 }
 0x13b   :  { %v35_v12 = vadd.f32 0.0001, %v34_v11 }
 0x13d   :  { %v36_v13 = vmul.f32 4.0, %v35_v12 }
 0x13f   :  { %78 = vrcp.f32 %v36_v13 }
 0x149   :  { %v79_v14 = vpop.eup %78 }
 0x14a   :  { %v39_v15 = vmul.f32 %v79_v14, %v29_v7  ;;  %v40_v16 = vmul.f32 %v79_v14, %v30_v8 }
 0x14c   :  { %v41_v17 = vadd.f32 0.5, %v39_v15  ;;  %v42_v18 = vadd.f32 0.5, %v40_v16 }
 0x14e   :  { %v74_v19 = vmul.f32 -1.442695, %v41_v17  ;;  %v75_v20 = vmul.f32 -1.442695, %v42_v18 }
 0x150   :  { %80 = vpow2.f32 %v74_v19 }
 0x151   :  { %82 = vpow2.f32 %v75_v20 }
 0x15a   :  { %v81_v21 = vpop.eup %80 }
 0x15b   :  { %v83_v22 = vpop.eup %82  ;;  %v49_v23 = vadd.f32 1.0, %v81_v21 }
 0x15c   :  { %v50_v24 = vadd.f32 1.0, %v83_v22 }
 0x15d   :  { %84 = vrcp.f32 %v49_v23 }
 0x15e   :  { %86 = vrcp.f32 %v50_v24 }
 0x167   :  { %v85_v25 = vpop.eup %84 }
 0x168   :  { %v87_v26 = vpop.eup %86  ;;  %v55_v27 = vmul.f32 %v85_v25, %v21_v0 }
 0x169   :  { %v56_v28 = vmul.f32 %v87_v26, %v22_v1 }
 0x16a   :  { %57 = vst [vmem:[#allocation5] sm:$0xff] %v55_v27 }
 0x16b   :  { %58 = vst [vmem:[#allocation5 + $0x8] sm:$0xff] %v56_v28 }
 0x16c   :  { %121 = shalt.err (!%p118_p12)
}
 0x16d   :  { %s122_s22 = scalar_lea.hbm %s173_s1, 256 }
 0x16e   :  { %p123_p13 = scmp.ne.s32.totalorder %s173_s1, %s122_s22  ;;  %p126_p0 = scmp.lt.u32.totalorder %s122_s22, %s173_s1 }
 0x170   :  { %p128_p1 = pnand %p126_p0, %p123_p13 }
 0x172   :  { %131 = shalt.err (!%p128_p1)
}
 0x173   :  { %68 = dma.vmem_to_hbm [thread:$0]  %s66_s18, 256, %s173_s1, [#allocation4]  }
 0x174   :  { %134 = dma.done.wait [#allocation4], 256  }
 0x175   :  { %135 = vsyncadd [#allocation4], 4294967040 }
 0x176   :  { %72 = vsyncpa [#allocation3], 1 }
 0x177   :  { %73 = vsyncpa [#allocation4], 1 }

</bundles_post_ra>
